<compile_context>
chip_gen: v6e
topology: v6e:2x2x1
jax: 0.10.0
libtpu: 0.0.40
codegen_flags: <defaults>
</compile_context>

<pallas_src>
import functools

import jax
import jax.numpy as jnp
from jax.experimental import pallas as pl
from jax.experimental.pallas import tpu as pltpu


def _round_up(x, m):
    return (x + m - 1) // m * m


def mlp_kernel(x_ref,
               w1_ref, b1_ref,
               w2_ref, b2_ref,
               w3_ref, b3_ref,
               w4_ref, b4_ref,
               o_ref):
    """x_ref: [TILE_B, F] float32 (native layout).

    Activations run transposed as [H, TILE_B] so the batch sits on the 128-lane axis
    and the final [1, TILE_B] store is lane-dense and unmasked.
    """
    # Cast + transpose inside the kernel (hidden under the x DMA). Layer 1:
    # [H, F] @ [F, TB] -> [H, TB], f32 accumulation on the MXU; bias + ReLU in f32.
    xt = x_ref[...].astype(jnp.bfloat16).T
    h = jnp.dot(w1_ref[...], xt, preferred_element_type=jnp.float32)
    h = jnp.maximum(h + b1_ref[...], 0.0)
    # Layer 2: [H, H] @ [H, TB]
    h = jnp.dot(w2_ref[...], h.astype(jnp.bfloat16), preferred_element_type=jnp.float32)
    h = jnp.maximum(h + b2_ref[...], 0.0)
    # Layer 3: [H, H] @ [H, TB]
    h = jnp.dot(w3_ref[...], h.astype(jnp.bfloat16), preferred_element_type=jnp.float32)
    h = jnp.maximum(h + b3_ref[...], 0.0)
    # Layer 4: [1, H] @ [H, TB] -> [1, TB] (lane-dense), then sigmoid on the EUP.
    z = jnp.dot(w4_ref[...], h.astype(jnp.bfloat16), preferred_element_type=jnp.float32)
    o_ref[...] = jax.nn.sigmoid(z + b4_ref[...])


def _choose_tile_b(batch, target):
    """Pick the batch-tile width: large (amortize ~0.35us/step grid overhead), at
    least 2 grid steps for big batches (v7x megacore), bounded padding waste,
    128-aligned for lane-dense blocks."""
    if batch <= 256:
        return batch                                   # single full-extent tile
    n_tiles = max(2, pl.cdiv(batch, target))
    tile = _round_up(pl.cdiv(batch, n_tiles), 128)
    return min(tile, _round_up(batch, 128))


@functools.partial(jax.jit, static_argnames=("tile_b",))
def classifier_forward(x, params, *, tile_b=16384):
    """x: [B, F] float32; params: w_i of shape [out, in], b_i of shape [out, 1].

    Returns sigmoid(MLP(x)) with shape [B, 1].
    """
    B, F = x.shape
    tb = _choose_tile_b(int(B), int(tile_b))
    num_tiles = pl.cdiv(B, tb)                         # last tile may be masked (no pad pass)

    w = [params[f"w{i}"].astype(jnp.bfloat16) for i in (1, 2, 3, 4)]
    b = [params[f"b{i}"].astype(jnp.float32) for i in (1, 2, 3, 4)]
    H = w[0].shape[0]

    def pinned(arr):
        # Whole array with a constant block index -> DMA'd once, resident in VMEM.
        return pl.BlockSpec(arr.shape, lambda i: (0, 0))

    cost = pl.CostEstimate(
        flops=2 * int(B) * (F * H + 2 * H * H + H),
        transcendentals=int(B),                        # sigmoid
        bytes_accessed=int(B) * F * 4 + int(B) * 4
        + sum(a.size * a.dtype.itemsize for a in w + b),
    )

    out = pl.pallas_call(
        mlp_kernel,
        out_shape=jax.ShapeDtypeStruct((1, B), jnp.float32),
        grid=(num_tiles,),
        in_specs=[
            pl.BlockSpec((tb, F), lambda i: (i, 0)),   # streamed native-layout x tile
            pinned(w[0]), pinned(b[0]),
            pinned(w[1]), pinned(b[1]),
            pinned(w[2]), pinned(b[2]),
            pinned(w[3]), pinned(b[3]),
        ],
        out_specs=pl.BlockSpec((1, tb), lambda i: (0, i)),
        compiler_params=pltpu.CompilerParams(
            dimension_semantics=("parallel",),         # v7x: shard batch tiles across both TCs
            vmem_limit_bytes=32 * 1024 * 1024),        # headroom for 16K-lane tiles on v5e too
        cost_estimate=cost,
    )(x.astype(jnp.float32), w[0], b[0], w[1], b[1], w[2], b[2], w[3], b[3])

    return out.T                                       # [1, B] -> [B, 1]


def init_params(key, n_features, n_hidden=32):
    """Deterministic init mimicking nn.Linear's U(-1/sqrt(fan_in), 1/sqrt(fan_in)).

    Weights are stored in PyTorch-native [out, in] layout; biases as [out, 1].
    """
    dims = [(n_features, n_hidden), (n_hidden, n_hidden),
            (n_hidden, n_hidden), (n_hidden, 1)]
    params = {}
    for i, (fan_in, fan_out) in enumerate(dims, start=1):
        key, kw, kb = jax.random.split(key, 3)
        bound = 1.0 / jnp.sqrt(jnp.float32(fan_in))
        params[f"w{i}"] = jax.random.uniform(
            kw, (fan_out, fan_in), jnp.float32, minval=-bound, maxval=bound)
        params[f"b{i}"] = jax.random.uniform(
            kb, (fan_out, 1), jnp.float32, minval=-bound, maxval=bound)
    return params


def ref_forward(x, params):
    """Plain-JAX reference with the same bf16-matmul / f32-accumulate math."""
    h = x.T.astype(jnp.bfloat16)
    for i in (1, 2, 3):
        w = params[f"w{i}"].astype(jnp.bfloat16)
        h = jnp.dot(w, h, preferred_element_type=jnp.float32) + params[f"b{i}"]
        h = jnp.maximum(h, 0.0).astype(jnp.bfloat16)
    w4 = params["w4"].astype(jnp.bfloat16)
    z = jnp.dot(w4, h, preferred_element_type=jnp.float32) + params["b4"]
    return jax.nn.sigmoid(z)[0][:, None]


if __name__ == "__main__":
    key = jax.random.PRNGKey(0)
    k_x, k_p, k_x2 = jax.random.split(key, 3)

    batch = 8
    n_features = 16
    n_hidden = 32

    x = jax.random.normal(k_x, (batch, n_features), jnp.float32)
    params = init_params(k_p, n_features, n_hidden)

    out = jax.block_until_ready(classifier_forward(x, params))
    assert out.shape == (batch, 1)
    ref = ref_forward(x, params)
    assert jnp.allclose(out, ref, atol=2e-3, rtol=2e-3), (
        f"max abs err = {jnp.max(jnp.abs(out - ref))}")

    # Second check: multi-step grid with a non-divisible (masked) last batch tile.
    batch2 = 300
    x2 = jax.random.normal(k_x2, (batch2, n_features), jnp.float32)
    out2 = jax.block_until_ready(classifier_forward(x2, params, tile_b=128))
    ref2 = ref_forward(x2, params)
    assert out2.shape == (batch2, 1)
    assert jnp.allclose(out2, ref2, atol=2e-3, rtol=2e-3), (
        f"max abs err = {jnp.max(jnp.abs(out2 - ref2))}")

    print("KERNEL_OK")
</pallas_src>

<mosaic_0001>
module attributes {stable_mosaic.version = 11 : i64} {
  func.func @mlp_kernel(%arg0: i32, %arg1: memref<8x16xf32, #tpu.memory_space<vmem>>, %arg2: memref<32x16xbf16, #tpu.memory_space<vmem>>, %arg3: memref<32x1xf32, #tpu.memory_space<vmem>>, %arg4: memref<32x32xbf16, #tpu.memory_space<vmem>>, %arg5: memref<32x1xf32, #tpu.memory_space<vmem>>, %arg6: memref<32x32xbf16, #tpu.memory_space<vmem>>, %arg7: memref<32x1xf32, #tpu.memory_space<vmem>>, %arg8: memref<1x32xbf16, #tpu.memory_space<vmem>>, %arg9: memref<1x1xf32, #tpu.memory_space<vmem>>, %arg10: memref<1x8xf32, #tpu.memory_space<vmem>>) attributes {dimension_semantics = [#tpu.dimension_semantics<parallel>], iteration_bounds = array<i64: 1>, scalar_prefetch = 0 : i64, scratch_operands = 0 : i64, tpu.core_type = #tpu.core_type<tc>, window_params = [{transform_indices = @transform_0, window_bounds = array<i64: 8, 16>}, {pipeline_mode = #tpu.pipeline_mode<synchronous>, transform_indices = @transform_1, window_bounds = array<i64: 32, 16>}, {pipeline_mode = #tpu.pipeline_mode<synchronous>, transform_indices = @transform_2, window_bounds = array<i64: 32, 1>}, {pipeline_mode = #tpu.pipeline_mode<synchronous>, transform_indices = @transform_3, window_bounds = array<i64: 32, 32>}, {pipeline_mode = #tpu.pipeline_mode<synchronous>, transform_indices = @transform_4, window_bounds = array<i64: 32, 1>}, {pipeline_mode = #tpu.pipeline_mode<synchronous>, transform_indices = @transform_5, window_bounds = array<i64: 32, 32>}, {pipeline_mode = #tpu.pipeline_mode<synchronous>, transform_indices = @transform_6, window_bounds = array<i64: 32, 1>}, {pipeline_mode = #tpu.pipeline_mode<synchronous>, transform_indices = @transform_7, window_bounds = array<i64: 1, 32>}, {pipeline_mode = #tpu.pipeline_mode<synchronous>, transform_indices = @transform_8, window_bounds = array<i64: 1, 1>}, {transform_indices = @transform_9, window_bounds = array<i64: 1, 8>}]} {
    %c0 = arith.constant 0 : index
    %c0_0 = arith.constant 0 : index
    %0 = vector.load %arg1[%c0, %c0_0] : memref<8x16xf32, #tpu.memory_space<vmem>>, vector<8x16xf32>
    %1 = arith.truncf %0 : vector<8x16xf32> to vector<8x16xbf16>
    %2 = tpu.transpose %1, [1, 0] : vector<8x16xbf16> -> vector<16x8xbf16>
    %c0_1 = arith.constant 0 : index
    %c0_2 = arith.constant 0 : index
    %3 = vector.load %arg2[%c0_1, %c0_2] : memref<32x16xbf16, #tpu.memory_space<vmem>>, vector<32x16xbf16>
    %cst = arith.constant dense<0.000000e+00> : vector<32x8xf32>
    %4 = tpu.matmul %3, %2, %cst {dimension_numbers = #tpu.dot_dimension_numbers<[1], [0], [0], [1], [0, 0, 1, 1], [], []>} : vector<32x16xbf16>, vector<16x8xbf16>, vector<32x8xf32> -> vector<32x8xf32>
    %c0_3 = arith.constant 0 : index
    %c0_4 = arith.constant 0 : index
    %5 = vector.load %arg3[%c0_3, %c0_4] : memref<32x1xf32, #tpu.memory_space<vmem>>, vector<32x1xf32>
    %6 = vector.broadcast %5 : vector<32x1xf32> to vector<32x8xf32>
    %7 = arith.addf %4, %6 : vector<32x8xf32>
    %cst_5 = arith.constant 0.000000e+00 : f32
    %8 = vector.broadcast %cst_5 : f32 to vector<32x8xf32>
    %9 = arith.maximumf %7, %8 : vector<32x8xf32>
    %c0_6 = arith.constant 0 : index
    %c0_7 = arith.constant 0 : index
    %10 = vector.load %arg4[%c0_6, %c0_7] : memref<32x32xbf16, #tpu.memory_space<vmem>>, vector<32x32xbf16>
    %11 = arith.truncf %9 : vector<32x8xf32> to vector<32x8xbf16>
    %cst_8 = arith.constant dense<0.000000e+00> : vector<32x8xf32>
    %12 = tpu.matmul %10, %11, %cst_8 {dimension_numbers = #tpu.dot_dimension_numbers<[1], [0], [0], [1], [0, 0, 1, 1], [], []>} : vector<32x32xbf16>, vector<32x8xbf16>, vector<32x8xf32> -> vector<32x8xf32>
    %c0_9 = arith.constant 0 : index
    %c0_10 = arith.constant 0 : index
    %13 = vector.load %arg5[%c0_9, %c0_10] : memref<32x1xf32, #tpu.memory_space<vmem>>, vector<32x1xf32>
    %14 = vector.broadcast %13 : vector<32x1xf32> to vector<32x8xf32>
    %15 = arith.addf %12, %14 : vector<32x8xf32>
    %cst_11 = arith.constant 0.000000e+00 : f32
    %16 = vector.broadcast %cst_11 : f32 to vector<32x8xf32>
    %17 = arith.maximumf %15, %16 : vector<32x8xf32>
    %c0_12 = arith.constant 0 : index
    %c0_13 = arith.constant 0 : index
    %18 = vector.load %arg6[%c0_12, %c0_13] : memref<32x32xbf16, #tpu.memory_space<vmem>>, vector<32x32xbf16>
    %19 = arith.truncf %17 : vector<32x8xf32> to vector<32x8xbf16>
    %cst_14 = arith.constant dense<0.000000e+00> : vector<32x8xf32>
    %20 = tpu.matmul %18, %19, %cst_14 {dimension_numbers = #tpu.dot_dimension_numbers<[1], [0], [0], [1], [0, 0, 1, 1], [], []>} : vector<32x32xbf16>, vector<32x8xbf16>, vector<32x8xf32> -> vector<32x8xf32>
    %c0_15 = arith.constant 0 : index
    %c0_16 = arith.constant 0 : index
    %21 = vector.load %arg7[%c0_15, %c0_16] : memref<32x1xf32, #tpu.memory_space<vmem>>, vector<32x1xf32>
    %22 = vector.broadcast %21 : vector<32x1xf32> to vector<32x8xf32>
    %23 = arith.addf %20, %22 : vector<32x8xf32>
    %cst_17 = arith.constant 0.000000e+00 : f32
    %24 = vector.broadcast %cst_17 : f32 to vector<32x8xf32>
    %25 = arith.maximumf %23, %24 : vector<32x8xf32>
    %c0_18 = arith.constant 0 : index
    %c0_19 = arith.constant 0 : index
    %26 = vector.load %arg8[%c0_18, %c0_19] : memref<1x32xbf16, #tpu.memory_space<vmem>>, vector<1x32xbf16>
    %27 = arith.truncf %25 : vector<32x8xf32> to vector<32x8xbf16>
    %cst_20 = arith.constant dense<0.000000e+00> : vector<1x8xf32>
    %28 = tpu.matmul %26, %27, %cst_20 {dimension_numbers = #tpu.dot_dimension_numbers<[1], [0], [0], [1], [0, 0, 1, 1], [], []>} : vector<1x32xbf16>, vector<32x8xbf16>, vector<1x8xf32> -> vector<1x8xf32>
    %c0_21 = arith.constant 0 : index
    %c0_22 = arith.constant 0 : index
    %29 = vector.load %arg9[%c0_21, %c0_22] : memref<1x1xf32, #tpu.memory_space<vmem>>, vector<1x1xf32>
    %30 = vector.broadcast %29 : vector<1x1xf32> to vector<1x8xf32>
    %31 = arith.addf %28, %30 : vector<1x8xf32>
    %32 = arith.negf %31 : vector<1x8xf32>
    %33 = math.exp %32 : vector<1x8xf32>
    %cst_23 = arith.constant 1.000000e+00 : f32
    %34 = vector.broadcast %cst_23 : f32 to vector<1x8xf32>
    %35 = arith.addf %34, %33 : vector<1x8xf32>
    %36 = arith.divf %34, %35 : vector<1x8xf32>
    %c0_24 = arith.constant 0 : index
    %c0_25 = arith.constant 0 : index
    %37 = vector.load %arg10[%c0_24, %c0_25] : memref<1x8xf32, #tpu.memory_space<vmem>>, vector<1x8xf32>
    tpu.vector_store %arg10[%c0_24, %c0_25], %36 {strides = array<i32>} : memref<1x8xf32, #tpu.memory_space<vmem>>, vector<1x8xf32>,
    return
  }
  func.func @transform_0(%arg0: i32) -> (i32, i32) {
    %c0_i32 = arith.constant 0 : i32
    %c0_i32_0 = arith.constant 0 : i32
    return %arg0, %c0_i32 : i32, i32
  }
  func.func @transform_1(%arg0: i32) -> (i32, i32) {
    %c0_i32 = arith.constant 0 : i32
    %c0_i32_0 = arith.constant 0 : i32
    %c0_i32_1 = arith.constant 0 : i32
    return %c0_i32, %c0_i32_0 : i32, i32
  }
  func.func @transform_2(%arg0: i32) -> (i32, i32) {
    %c0_i32 = arith.constant 0 : i32
    %c0_i32_0 = arith.constant 0 : i32
    %c0_i32_1 = arith.constant 0 : i32
    return %c0_i32, %c0_i32_0 : i32, i32
  }
  func.func @transform_3(%arg0: i32) -> (i32, i32) {
    %c0_i32 = arith.constant 0 : i32
    %c0_i32_0 = arith.constant 0 : i32
    %c0_i32_1 = arith.constant 0 : i32
    return %c0_i32, %c0_i32_0 : i32, i32
  }
  func.func @transform_4(%arg0: i32) -> (i32, i32) {
    %c0_i32 = arith.constant 0 : i32
    %c0_i32_0 = arith.constant 0 : i32
    %c0_i32_1 = arith.constant 0 : i32
    return %c0_i32, %c0_i32_0 : i32, i32
  }
  func.func @transform_5(%arg0: i32) -> (i32, i32) {
    %c0_i32 = arith.constant 0 : i32
    %c0_i32_0 = arith.constant 0 : i32
    %c0_i32_1 = arith.constant 0 : i32
    return %c0_i32, %c0_i32_0 : i32, i32
  }
  func.func @transform_6(%arg0: i32) -> (i32, i32) {
    %c0_i32 = arith.constant 0 : i32
    %c0_i32_0 = arith.constant 0 : i32
    %c0_i32_1 = arith.constant 0 : i32
    return %c0_i32, %c0_i32_0 : i32, i32
  }
  func.func @transform_7(%arg0: i32) -> (i32, i32) {
    %c0_i32 = arith.constant 0 : i32
    %c0_i32_0 = arith.constant 0 : i32
    %c0_i32_1 = arith.constant 0 : i32
    return %c0_i32, %c0_i32_0 : i32, i32
  }
  func.func @transform_8(%arg0: i32) -> (i32, i32) {
    %c0_i32 = arith.constant 0 : i32
    %c0_i32_0 = arith.constant 0 : i32
    %c0_i32_1 = arith.constant 0 : i32
    return %c0_i32, %c0_i32_0 : i32, i32
  }
  func.func @transform_9(%arg0: i32) -> (i32, i32) {
    %c0_i32 = arith.constant 0 : i32
    %c0_i32_0 = arith.constant 0 : i32
    return %c0_i32, %arg0 : i32, i32
  }
}

</mosaic_0001>

<bundles_post_ra>
// kernel: classifier_forward.1
= control target key start
LH: loop header
LB: loop body
LE: loop exit
PB: predicated region body
PF: predicated region fallthrough
CT: control target
= control target key end

     0   :  { %s642_s0 = inlined_call_operand.vmem [shape: f32[8,16], index: 0, kind: input, shape index: {}]   ;;  %s643_s1 = inlined_call_operand.vmem [shape: bf16[32,16], index: 1, kind: input, shape index: {}]   ;;  %s644_s2 = inlined_call_operand.vmem [shape: f32[32,1], index: 2, kind: input, shape index: {}]   ;;  %s645_s3 = inlined_call_operand.vmem [shape: bf16[32,32], index: 3, kind: input, shape index: {}]   ;;  %s646_s4 = inlined_call_operand.vmem [shape: f32[32,1], index: 4, kind: input, shape index: {}]   ;;  %s647_s5 = inlined_call_operand.vmem [shape: bf16[32,32], index: 5, kind: input, shape index: {}]   ;;  %s648_s6 = inlined_call_operand.vmem [shape: f32[32,1], index: 6, kind: input, shape index: {}]   ;;  %s649_s7 = inlined_call_operand.vmem [shape: bf16[1,32], index: 7, kind: input, shape index: {}]   ;;  %s650_s8 = inlined_call_operand.<no memory space> [shape: f32[1,1], index: 8, kind: input, shape index: {}]   ;;  %s651_s9 = inlined_call_operand.hbm [shape: f32[1,8], index: 9, kind: output, shape index: {}]  }
   0x1   :  { %v14_v0 = vstv %s650_s8 }
   0x2   :  { %15 = vst [vmem:[#allocation2] sm:$0x1] %v14_v0 }
   0x3   :  { %v36_v1 = vld [vmem:[%s642_s0] sm:$0xff]  ;;  %vm76_vm0 = vcmask 130048   ;;  %v513_v4 = vmov 0   ;;  %v44_v5 = vld [vmem:[%s644_s2 + $0x10] sm:$0xff]  ;;  %v45_v8 = vld [vmem:[%s644_s2 + $0x18] sm:$0xff] }
   0x4   :  { %v37_v2 = vpack.c.bf16 %v36_v1, %v36_v1  ;;  %v481_v3 = vld [vmem:[%s643_s1] sm:$0xff]   ;;  %479 = vset.pattern.permute.xlu0 %v513_v4  ;;  %480 = vset.pattern.permute.xlu1 %v513_v4  ;;  %v482_v9 = vld [vmem:[%s643_s1 + $0x8] sm:$0xff]   ;;  %v147_v11 = vld [vmem:[%s646_s4 + $0x10] sm:$0xff] }
   0x5   :  { %446 = vmatprep.mubr.msk.bf16.mxu0 %vm76_vm0, %v481_v3  ;;  %v42_v7 = vld [vmem:[%s644_s2] sm:$0xff]  ;;  %58 = vperm.xlu0 %479, %v44_v5   ;;  %v43_v10 = vld [vmem:[%s644_s2 + $0x8] sm:$0xff] }
   0x6   :  { %474 = vmatprep.subr.msk.bf16.mxu0 %vm76_vm0, %v37_v2  ;;  %v84_v6 = vsel %vm76_vm0, %v37_v2, 0  ;;  %48 = vperm.xlu1 %480, %v42_v7  }
   0x7   :  { %445 = vmatpush3.bf16.xpose.msra.mxu0 %v84_v6 }
   0x9   :  { %63 = vperm.xlu0 %479, %v45_v8  }
   0xa   :  { %53 = vperm.xlu1 %480, %v43_v10  }
   0xb   :  { %16 = vsyncpa [#allocation4], 0  ;;  %v148_v12 = vld [vmem:[%s646_s4 + $0x18] sm:$0xff]  ;;  %v145_v13 = vld [vmem:[%s646_s4] sm:$0xff]  ;;  %vm179_vm1 = vcmask 261120   ;;  %v514_v60 = vmov 0.0  }
   0xc   :  { %v146_v14 = vld [vmem:[%s646_s4 + $0x8] sm:$0xff]  ;;  %v247_v15 = vld [vmem:[%s648_s6 + $0x10] sm:$0xff]  ;;  %v248_v16 = vld [vmem:[%s648_s6 + $0x18] sm:$0xff]  ;;  %vm515_vm2 = vmmov 0   ;;  %s516_s20 = smov [#allocation3]   ;;  %vm400_vm3 = vcmask 57344  }
   0xd   :  { %161 = vperm.xlu0 %479, %v147_v11   ;;  %v245_v17 = vld [vmem:[%s648_s6] sm:$0xff]  ;;  %v246_v18 = vld [vmem:[%s648_s6 + $0x8] sm:$0xff]  ;;  %s408_s21 = sshll.u32 %s516_s20, 4  ;;  %s409_s21 = int_to_ptr.vmem [resolvable:$true] %s408_s21 }
   0xe   :  { %447 = vmatmul.mubr.msk.bf16.vlgmr.msra.gmra.mxu0 %vm76_vm0, %v482_v9  ;;  %166 = vperm.xlu1 %480, %v148_v12   ;;  %v341_v19 = vld [vmem:[#allocation2] sm:$0x1]  ;;  %v484_v39 = vld [vmem:[%s645_s3 + $0x8] sm:$0xff]   ;;  %s495_s22 = scalar_lea.vmem %s409_s21, 32  ;;  %p496_p1 = scmp.lt.s32.totalorder %s409_s21, %s409_s21 }
   0xf   :  { %v483_v20 = vld [vmem:[%s645_s3] sm:$0xff]   ;;  %v486_v59 = vld [vmem:[%s647_s5 + $0x8] sm:$0xff]  }
  0x10   :  { %454 = vmatprep.mubr.msk.bf16.mxu1 %vm179_vm1, %v483_v20  ;;  %v485_v40 = vld [vmem:[%s647_s5] sm:$0xff]  }
  0x11   :  { %151 = vperm.xlu0 %479, %v145_v13   ;;  %462 = vmatprep.mubr.msk.bf16.mxu0 %vm179_vm1, %v485_v40 }
  0x12   :  { %156 = vperm.xlu1 %480, %v146_v14  }
  0x15   :  { %261 = vperm.xlu0 %479, %v247_v15   ;;  %v338_v15 = vld [vmem:[%s649_s7] sm:$0x1]  ;;  %s491_s7 = scalar_lea.vmem %s409_s21, 16 }
  0x16   :  { %266 = vperm.xlu1 %480, %v248_v16   ;;  %v347_v16 = vlaneseq  ;;  %p492_p0 = scmp.ne.s32.totalorder %s409_s21, %s491_s7  ;;  %p497_p2 = scmp.lt.s32.totalorder %s495_s22, %s491_s7 }
  0x18   :  { %p498_p3 = por %p497_p2, %p496_p1 }
  0x19   :  { %251 = vperm.xlu0 %479, %v245_v17   ;;  %v348_v17 = vshrl.u32 %v347_v16, 7 }
  0x1a   :  { %256 = vperm.xlu1 %480, %v246_v18   ;;  %p499_p4 = pnand %p498_p3, %p492_p0 }
  0x1b   :  { %v349_v18 = vsub.s32 0, %v348_v17 }
  0x1d   :  { %344 = vperm.xlu0 %479, %v341_v19  }
  0x80   :  { %v59_v21 = vpop.permute.xlu0 %58 }
  0x81   :  { %v49_v22 = vpop.permute.xlu1 %48 }
  0x84   :  { %v64_v26 = vpop.permute.xlu0 %63 }
  0x85   :  { %v54_v30 = vpop.permute.xlu1 %53 }
  0x88   :  { %v162_v41 = vpop.permute.xlu0 %161 }
  0x89   :  { %v167_v42 = vpop.permute.xlu1 %166 }
  0x8c   :  { %v152_v46 = vpop.permute.xlu0 %151 }
  0x8d   :  { %v157_v50 = vpop.permute.xlu1 %156 }
  0x90   :  { %v262_v61 = vpop.permute.xlu0 %261 }
  0x91   :  { %v267_v62 = vpop.permute.xlu1 %266 }
  0x94   :  { %v252_v3 = vpop.permute.xlu0 %251 }
  0x95   :  { %v257_v5 = vpop.permute.xlu1 %256 }
  0x98   :  { %v345_v19 = vpop.permute.xlu0 %344 }
  0x99   :  { %v350_v20 = vrot.slane %v345_v19, %v349_v18 }
  0xce   :  { %v448_v23 = vpop.f32.mrf.mxu0 }
  0xcf   :  { %v129_v25 = vadd.f32 %v448_v23, %v59_v21 }
  0xd0   :  { %v120_v24 = vpop.f32.mrf.mxu0 }
  0xd1   :  { %v121_v28 = vadd.f32 %v120_v24, %v49_v22  ;;  %v137_v32 = vmax.f32 %v129_v25, 0.0 }
  0xd2   :  { %v449_v27 = vpop.f32.mrf.mxu0 }
  0xd3   :  { %v132_v29 = vadd.f32 %v449_v27, %v64_v26  ;;  %v135_v35 = vmax.f32 %v121_v28, 0.0 }
  0xd4   :  { %v123_v31 = vpop.f32.mrf.mxu0 }
  0xd5   :  { %v138_v33 = vmax.f32 %v132_v29, 0.0  ;;  %v124_v34 = vadd.f32 %v123_v31, %v54_v30 }
  0xd7   :  { %v136_v36 = vmax.f32 %v124_v34, 0.0  ;;  %v144_v37 = vpack.c.bf16 %v138_v33, %v137_v32 }
  0xd9   :  { %v143_v38 = vpack.c.bf16 %v136_v36, %v135_v35  ;;  %450 = vmatprep.subr.bf16.mxu1 %v144_v37 }
  0xda   :  { %451 = vmatpush3.bf16.msra.mxu1 %v144_v37 }
  0xdb   :  { %452 = vmatprep.subr.bf16.mxu1 %v143_v38 }
  0xde   :  { %453 = vmatpush3.bf16.msra.mxu1 %v143_v38 }
  0xdf   :  { %466 = vmatprep.subr.bf16.mxu1 %v514_v60 }
  0xe1   :  { %455 = vmatmul.mubr.msk.bf16.vlgmr.msra.gmra.mxu1 %vm179_vm1, %v484_v39 }
  0xe2   :  { %470 = vmatprep.mubr.msk.bf16.mxu1 %vm515_vm2, %v514_v60 }
 0x1a1   :  { %v456_v43 = vpop.f32.mrf.mxu1 }
 0x1a2   :  { %v229_v45 = vadd.f32 %v456_v43, %v162_v41 }
 0x1a3   :  { %v220_v44 = vpop.f32.mrf.mxu1 }
 0x1a4   :  { %v221_v48 = vadd.f32 %v220_v44, %v152_v46  ;;  %v237_v52 = vmax.f32 %v229_v45, 0.0 }
 0x1a5   :  { %v457_v47 = vpop.f32.mrf.mxu1 }
 0x1a6   :  { %v232_v49 = vadd.f32 %v457_v47, %v167_v42  ;;  %v235_v55 = vmax.f32 %v221_v48, 0.0 }
 0x1a7   :  { %v223_v51 = vpop.f32.mrf.mxu1 }
 0x1a8   :  { %v238_v53 = vmax.f32 %v232_v49, 0.0  ;;  %v224_v54 = vadd.f32 %v223_v51, %v157_v50 }
 0x1aa   :  { %v244_v56 = vpack.c.bf16 %v238_v53, %v237_v52  ;;  %v236_v57 = vmax.f32 %v224_v54, 0.0 }
 0x1ac   :  { %v243_v58 = vpack.c.bf16 %v236_v57, %v235_v55  ;;  %458 = vmatprep.subr.bf16.mxu0 %v244_v56 }
 0x1ad   :  { %459 = vmatpush3.bf16.msra.mxu0 %v244_v56 }
 0x1ae   :  { %460 = vmatprep.subr.bf16.mxu0 %v243_v58 }
 0x1b1   :  { %461 = vmatpush3.bf16.msra.mxu0 %v243_v58 }
 0x1b4   :  { %463 = vmatmul.mubr.msk.bf16.vlgmr.msra.gmra.mxu0 %vm179_vm1, %v486_v59 }
 0x274   :  { %v464_v63 = vpop.f32.mrf.mxu0 }
 0x275   :  { %v328_v1 = vadd.f32 %v464_v63, %v262_v61 }
 0x276   :  { %v319_v0 = vpop.f32.mrf.mxu0 }
 0x277   :  { %v336_v7 = vmax.f32 %v328_v1, 0.0  ;;  %v320_v8 = vadd.f32 %v319_v0, %v252_v3 }
 0x278   :  { %v465_v2 = vpop.f32.mrf.mxu0 }
 0x279   :  { %v331_v4 = vadd.f32 %v465_v2, %v267_v62  ;;  %v334_v13 = vmax.f32 %v320_v8, 0.0 }
 0x27a   :  { %v322_v6 = vpop.f32.mrf.mxu0 }
 0x27b   :  { %v337_v9 = vmax.f32 %v331_v4, 0.0  ;;  %v323_v10 = vadd.f32 %v322_v6, %v257_v5 }
 0x27d   :  { %v340_v11 = vpack.c.bf16 %v337_v9, %v336_v7  ;;  %v335_v12 = vmax.f32 %v323_v10, 0.0 }
 0x27f   :  { %467 = vmatpush3.bf16.msra.mxu1 %v340_v11  ;;  %v339_v14 = vpack.c.bf16 %v335_v12, %v334_v13 }
 0x280   :  { %468 = vmatprep.subr.bf16.mxu1 %v514_v60 }
 0x283   :  { %469 = vmatpush3.bf16.msra.mxu1 %v339_v14 }
 0x286   :  { %471 = vmatmul.mubr.msk.bf16.vlgmr.msra.gmra.mxu1 %vm179_vm1, %v338_v15 }
 0x346   :  { %v388_v21 = vpop.f32.mrf.mxu1 }
 0x347   :  { %v389_v22 = vadd.f32 %v388_v21, %v350_v20 }
 0x348   :  { %v472_v23 = vpop.f32.mrf.mxu1 }
 0x349   :  { %v429_v24 = vmul.f32 -1.442695, %v389_v22 }
 0x34a   :  { %v391_v25 = vpop.f32.mrf.mxu1 }
 0x34b   :  { %487 = vpow2.f32 %v429_v24 }
 0x34c   :  { %v473_v26 = vpop.f32.mrf.mxu1 }
 0x358   :  { %v488_v27 = vpop.eup %487 }
 0x359   :  { %v397_v28 = vadd.f32 1.0, %v488_v27 }
 0x35b   :  { %489 = vrcp.f32 %v397_v28 }
 0x368   :  { %v490_v29 = vpop.eup %489 }
 0x369   :  { %401 = vst.msk [vmem:[#allocation3] sm:$0x1] %vm400_vm3, %v490_v29 }
 0x36a   :  { %502 = shalt.err (!%p499_p4)
}
 0x36b   :  { %411 = dma.vmem_to_hbm [thread:$0]  %s409_s21, 16, %s651_s9, [#allocation4]  }
 0x36c   :  { %511 = dma.done.wait [#allocation4], 16  }
 0x36d   :  { %512 = vsyncadd [#allocation4], 4294967280 }
 0x36e   :  { %415 = vsyncpa [#allocation4], 1 }

</bundles_post_ra>
